<compile_context>
chip_gen: v7x
topology: tpu7x:2x2x1
jax: 0.10.0
libtpu: 0.0.40
codegen_flags: <defaults>
</compile_context>

<pallas_src>
import functools

import jax
import jax.numpy as jnp
from jax.experimental import pallas as pl
from jax.experimental.pallas import tpu as pltpu

_NEG = -1e30  # python float (kernels must not capture jnp array constants)


def _round_up(x, m):
    return (x + m - 1) // m * m


def _vmem_capacity_bytes():
    try:
        cap = int(pltpu.get_tpu_info().vmem_capacity_bytes)
        return max(cap, 32 << 20)
    except Exception:
        return 64 << 20          # conservative: v7x physical VMEM


def _tile_bytes(rows, cols, itemsize):
    """Approx. VMEM footprint of a (rows, cols) buffer incl. (8,128) tiling."""
    sub = {4: 8, 2: 16, 1: 32}.get(itemsize, 8)
    return _round_up(max(rows, 1), sub) * _round_up(max(cols, 1), 128) * itemsize


def _vmem_footprint(block_rows, h, t_v, emit_logits, logits_itemsize):
    b = 0
    b += 2 * 3 * _tile_bytes(block_rows, 1, 4)        # labels / valid / label-logit
    b += 2 * _tile_bytes(block_rows, h, 2)            # hidden block (bf16)
    b += 2 * _tile_bytes(h, t_v, 2)                   # W slab (bf16, streamed)
    b += 2 * _tile_bytes(1, t_v, 4)                   # bias slab
    if emit_logits:
        b += 2 * _tile_bytes(block_rows, t_v, logits_itemsize)
    b += 2 * _tile_bytes(block_rows, 1, 4)            # pred output block
    b += 2 * _tile_bytes(1, 128, 4)                   # stats output block
    b += 6 * _tile_bytes(block_rows, 1, 4)            # online accumulator scratch
    return b


def _pad_vocab(v, block_v):
    v128 = _round_up(v, 128)
    return v128 if v128 <= block_v else _round_up(v, block_v)


def prepare_loss_params(emb, w_out, b_out, block_v=1024):
    """One-time parameter prep: bf16 embedding table and a bf16 vocab
    projection pre-padded to the vocab-tile multiple (removes the per-step
    H x V pad + cast HBM copy from the forward pass)."""
    V = int(w_out.shape[-1])
    v_pad = _pad_vocab(V, block_v)
    w_p = jnp.pad(w_out, ((0, 0), (0, v_pad - V))).astype(jnp.bfloat16)
    b_p = jnp.pad(jnp.reshape(b_out, (1, -1)).astype(jnp.float32),
                  ((0, 0), (0, v_pad - V)))
    return {'emb': emb.astype(jnp.bfloat16), 'w_out': w_p, 'b_out': b_p,
            'vocab_size': V}


def _loss_head_kernel(labels_ref, valid_ref, labp_ref, h_ref, w_ref, b_ref,
                      *rest, emit_logits, top_k, label_smoothing, v_real,
                      v_pad, n_tokens, block_v):
    """Fused vocab projection + ONLINE log-softmax CE / argmax / top-k.

    Grid: (row blocks ["parallel"], vocab tiles ["arbitrary", innermost]).
      labels_ref: (R, 1) int32   target token ids
      valid_ref:  (R, 1) f32     1.0 at non-padded token positions
      labp_ref:   (R, 1) f32     label logit (precomputed; top-k count only)
      h_ref:      (R, H) bf16    tanh-activated hidden states
      w_ref:      (H, tV) bf16   vocab-projection slab (streamed)
      b_ref:      (1, tV) f32    bias slab
    Outputs:
      [logits (R, tV) bf16, written every tile -- optional],
      pred (R, 1) int32 (last tile), stats (1, 1, 128) f32 (last tile):
        lanes [loss_sum, valid_cnt, acc_sum, topk_sum, token_cnt, 0...].
    """
    if emit_logits:
        (logits_out_ref, pred_ref, stats_ref,
         m_s, l_s, sum_s, lab_s, cnt_s, arg_s) = rest
    else:
        (pred_ref, stats_ref, m_s, l_s, sum_s, lab_s, cnt_s, arg_s) = rest
        logits_out_ref = None

    i = pl.program_id(0)
    j = pl.program_id(1)
    n_vb = pl.num_programs(1)

    # ---- per-row-block init (first vocab tile) ----
    @pl.when(j == 0)
    def _():
        m_s[...] = jnp.full(m_s.shape, _NEG, jnp.float32)
        l_s[...] = jnp.zeros_like(l_s)
        sum_s[...] = jnp.zeros_like(sum_s)
        lab_s[...] = jnp.zeros_like(lab_s)
        cnt_s[...] = jnp.zeros_like(cnt_s)
        arg_s[...] = jnp.zeros_like(arg_s)

    labels_f = labels_ref[...].astype(jnp.float32)              # (R, 1)
    lab_pre = labp_ref[...]                                     # (R, 1)

    # ---- vocab-tile projection on the MXU (bf16 in, f32 accumulate) ----
    logits = jnp.dot(h_ref[...], w_ref[...],
                     preferred_element_type=jnp.float32) + b_ref[...]

    if emit_logits:
        logits_out_ref[...] = logits.astype(logits_out_ref.dtype)

    colf = (jax.lax.broadcasted_iota(jnp.int32, logits.shape, 1)
            + j * block_v).astype(jnp.float32)

    # pad-column masking only when the vocab is padded at all (python-level).
    if v_pad != v_real:
        real_col = colf < float(v_real)
        logits_m = jnp.where(real_col, logits, _NEG)
        sum_s[...] += jnp.sum(jnp.where(real_col, logits, 0.0),
                              axis=-1, keepdims=True)
    else:
        logits_m = logits
        sum_s[...] += jnp.sum(logits, axis=-1, keepdims=True)

    # ---- online max / argmax / sum-exp ----
    tile_max = jnp.max(logits_m, axis=-1, keepdims=True)
    tile_arg = jnp.min(jnp.where(logits_m == tile_max, colf, float(v_pad)),
                       axis=-1, keepdims=True)
    m_old = m_s[...]
    arg_s[...] = jnp.where(tile_max > m_old, tile_arg, arg_s[...])
    m_new = jnp.maximum(m_old, tile_max)
    l_s[...] = (l_s[...] * jnp.exp(m_old - m_new)
                + jnp.sum(jnp.exp(logits_m - m_new), axis=-1, keepdims=True))
    m_s[...] = m_new

    # ---- exact label logit (loss) / strict-greater count (top-k rank) ----
    is_label = colf == labels_f
    lab_s[...] += jnp.sum(jnp.where(is_label, logits, 0.0),
                          axis=-1, keepdims=True)
    gt = jnp.logical_and(logits_m > lab_pre, jnp.logical_not(is_label))
    cnt_s[...] += jnp.sum(jnp.where(gt, 1.0, 0.0), axis=-1, keepdims=True)

    # ---- finalize on the last vocab tile ----
    @pl.when(j == n_vb - 1)
    def _():
        lse = m_s[...] + jnp.log(l_s[...])
        nll = lse - lab_s[...]
        # smoothing term: -mean(logp) = lse - mean(logits) over the real vocab
        smooth = lse - sum_s[...] * (1.0 / v_real)
        tok_loss = (1.0 - label_smoothing) * nll + label_smoothing * smooth

        pred_f = arg_s[...]                          # (R, 1) argmax column
        pred_ref[...] = pred_f.astype(jnp.int32)

        valid = valid_ref[...]
        r = pred_f.shape[0]
        rows = jax.lax.broadcasted_iota(jnp.int32, (r, 1), 0) + i * r
        inrange = (rows < n_tokens).astype(jnp.float32)
        eqs = (pred_f == labels_f).astype(jnp.float32)
        topk_hit = (cnt_s[...] < float(top_k)).astype(jnp.float32)

        loss_sum = jnp.sum(tok_loss * valid, axis=0, keepdims=True)
        valid_cnt = jnp.sum(valid, axis=0, keepdims=True)
        acc_sum = jnp.sum(eqs * valid, axis=0, keepdims=True)
        topk_sum = jnp.sum(topk_hit * inrange, axis=0, keepdims=True)
        tok_cnt = jnp.sum(inrange, axis=0, keepdims=True)

        lane = jax.lax.broadcasted_iota(jnp.int32, (1, 128), 1)
        stats = (jnp.where(lane == 0, loss_sum, 0.0)
                 + jnp.where(lane == 1, valid_cnt, 0.0)
                 + jnp.where(lane == 2, acc_sum, 0.0)
                 + jnp.where(lane == 3, topk_sum, 0.0)
                 + jnp.where(lane == 4, tok_cnt, 0.0))
        stats_ref[...] = stats.reshape(1, 1, 128)


def loss_head(h_act, w_pad, b_pad, v_real, labels_flat, valid_flat, *,
              top_k, label_smoothing, block_rows=512, block_v=1024,
              emit_logits=True, logits_dtype=jnp.bfloat16):
    """Fused Pallas loss head over (N, H) tanh-activated hidden states.

    Returns (logits (N, V) or None, pred_flat (N,) int32, totals (128,) f32
    partial sums: [loss_sum, valid_cnt, acc_sum, topk_sum, token_cnt, ...]).
    """
    N, H = h_act.shape
    v_real = int(v_real)
    v_pad = int(w_pad.shape[-1])
    assert v_pad % 128 == 0 and v_pad >= v_real
    assert w_pad.dtype == jnp.bfloat16 and w_pad.shape[0] == H

    # ---- tile selection: biggest tiles that fit the VMEM budget ----
    logits_itemsize = jnp.dtype(logits_dtype).itemsize
    cap = _vmem_capacity_bytes()
    budget = int(cap * 0.55)
    block_rows = max(8, min(_round_up(block_rows, 8), _round_up(N, 8)))
    block_v = max(128, min(_round_up(block_v, 128), v_pad))
    while (_vmem_footprint(block_rows, H, block_v, emit_logits,
                           logits_itemsize) > budget and block_v > 128):
        block_v //= 2
    while (_vmem_footprint(block_rows, H, block_v, emit_logits,
                           logits_itemsize) > budget and block_rows > 64):
        block_rows //= 2
    # largest 128-multiple <= block_v dividing the padded vocab
    t_v = (min(block_v, v_pad) // 128) * 128
    while v_pad % t_v != 0:
        t_v -= 128

    n_pad = _round_up(N, block_rows)
    n_blk = n_pad // block_rows
    v_blk = v_pad // t_v

    vmem_limit = int(min(cap - (2 << 20),
                         max(32 << 20,
                             2 * _vmem_footprint(block_rows, H, t_v,
                                                 emit_logits,
                                                 logits_itemsize))))

    # Label logit precomputed via a cheap per-token W-column gather; used only
    # for the online strict-greater (rank) count.  The loss uses the exact
    # in-kernel label logit, and the label column is excluded from the count,
    # so accumulation-order differences cannot shift the metric by the label's
    # own column.
    labels_i = labels_flat.astype(jnp.int32)
    labels_c = jnp.clip(labels_i, 0, v_real - 1)
    w_cols = jnp.take(w_pad, labels_c, axis=1)                   # (H, N) bf16
    lab_pre = (jnp.sum(h_act.astype(jnp.float32)
                       * jnp.transpose(w_cols).astype(jnp.float32), axis=-1)
               + b_pad[0, labels_c])                              # (N,) f32

    h_p = jnp.pad(h_act.astype(jnp.bfloat16), ((0, n_pad - N), (0, 0)))
    labels_p = jnp.pad(labels_i, (0, n_pad - N)).reshape(n_pad, 1)
    valid_p = jnp.pad(valid_flat.astype(jnp.float32),
                      (0, n_pad - N)).reshape(n_pad, 1)
    labp_p = jnp.pad(lab_pre.astype(jnp.float32),
                     (0, n_pad - N)).reshape(n_pad, 1)

    kernel = functools.partial(
        _loss_head_kernel, emit_logits=bool(emit_logits), top_k=int(top_k),
        label_smoothing=float(label_smoothing), v_real=v_real, v_pad=v_pad,
        n_tokens=int(N), block_v=int(t_v))

    out_shape = []
    out_specs = []
    if emit_logits:
        out_shape.append(jax.ShapeDtypeStruct((n_pad, v_pad), logits_dtype))
        out_specs.append(pl.BlockSpec((block_rows, t_v), lambda i, j: (i, j)))
    out_shape += [
        jax.ShapeDtypeStruct((n_pad, 1), jnp.int32),         # argmax prediction
        jax.ShapeDtypeStruct((n_blk, 1, 128), jnp.float32),  # lane-dense stats
    ]
    out_specs += [
        pl.BlockSpec((block_rows, 1), lambda i, j: (i, 0)),
        pl.BlockSpec((1, 1, 128), lambda i, j: (i, 0, 0)),
    ]

    in_specs = [
        pl.BlockSpec((block_rows, 1), lambda i, j: (i, 0)),   # labels
        pl.BlockSpec((block_rows, 1), lambda i, j: (i, 0)),   # valid mask
        pl.BlockSpec((block_rows, 1), lambda i, j: (i, 0)),   # label logit
        pl.BlockSpec((block_rows, H), lambda i, j: (i, 0)),   # hidden (bf16)
        pl.BlockSpec((H, t_v), lambda i, j: (0, j)),          # W slab (streamed)
        pl.BlockSpec((1, t_v), lambda i, j: (0, j)),          # bias slab
    ]

    scratch = [pltpu.VMEM((block_rows, 1), jnp.float32) for _ in range(6)]

    outs = pl.pallas_call(
        kernel,
        out_shape=tuple(out_shape),
        grid=(n_blk, v_blk),
        in_specs=in_specs,
        out_specs=tuple(out_specs),
        scratch_shapes=scratch,
        compiler_params=pltpu.CompilerParams(
            dimension_semantics=("parallel", "arbitrary"),
            vmem_limit_bytes=vmem_limit),
    )(labels_p, valid_p, labp_p, h_p, w_pad, b_pad)

    if emit_logits:
        logits_p, pred_out, stats = outs
        logits = logits_p[:N, :v_real]
    else:
        pred_out, stats = outs
        logits = None

    pred_flat = pred_out[:N, 0]
    totals = stats.reshape(n_blk, 128).sum(axis=0)
    return logits, pred_flat, totals


def loss_wrapper_forward(params, data, config=None, pad_id=0, bos_id=1,
                         eos_id=2, top_k=5, return_logits=True,
                         block_rows=512, block_v=1024):
    """JAX/Pallas equivalent of LossWrapper.forward (tforce, reduce_metrics)."""
    config = config or {}
    label_smoothing = float(config.get('label_smoothing', 0.0))
    loss_scale = 1.0 / config.get('n_grad_loops', 1)

    input_ids = data['input_ids']
    out_ids = data['output_ids']
    B, S = input_ids.shape

    # ---- mask bookkeeping (mirrors the torch code) ----
    if 'input_pad_mask' in data:
        inpt_pad_mask = data['input_pad_mask']
    else:
        inpt_pad_mask = (input_ids == pad_id) | (input_ids == eos_id)
    if 'output_pad_mask' in data:
        out_pad_mask = data['output_pad_mask']          # noqa: F841 (see NOTE)
    else:
        # torch quirk: `(out==pad) == bos_id` with bos_id=1 is a no-op on bools
        out_pad_mask = (out_ids == pad_id)              # noqa: F841
    if config.get('concat', False):
        inpt_pad_mask = jnp.zeros_like(input_ids, dtype=bool)
        out_pad_mask = jnp.zeros_like(out_ids, dtype=bool)   # noqa: F841
    if 'task_mask' in data:
        out_task_mask = data['task_mask'][:, 1:]
    else:
        out_task_mask = jnp.ones_like(inpt_pad_mask)

    # ---- synthetic wrapped model: bf16 embedding gather + tanh (XLA fuses
    # the tanh into the gather); the projection + loss head run in Pallas.
    # TODO(synk): fuse the embedding gather in-kernel via scalar-prefetched
    # token ids (pl.Element row index_map) to drop the (N, H) materialization.
    if 'vocab_size' in params:
        emb, w_pad, b_pad = params['emb'], params['w_out'], params['b_out']
        v_real = params['vocab_size']
    else:
        prepped = prepare_loss_params(params['emb'], params['w_out'],
                                      params['b_out'], block_v=block_v)
        emb, w_pad, b_pad = prepped['emb'], prepped['w_out'], prepped['b_out']
        v_real = prepped['vocab_size']

    h_act = jnp.tanh(emb[input_ids].astype(jnp.float32)).astype(jnp.bfloat16)
    h_act = h_act.reshape(B * S, -1)
    valid = (~inpt_pad_mask).reshape(-1).astype(jnp.float32)

    logits2d, pred_flat, totals = loss_head(
        h_act, w_pad, b_pad, v_real,
        out_ids.reshape(-1), valid,
        top_k=top_k, label_smoothing=label_smoothing,
        block_rows=block_rows, block_v=block_v, emit_logits=return_logits)

    loss_sum, valid_cnt = totals[0], totals[1]
    acc_sum, topk_sum, tok_cnt = totals[2], totals[3], totals[4]
    denom = jnp.maximum(valid_cnt, 1.0)
    loss = loss_scale * loss_sum / denom
    acc = acc_sum / denom
    # TODO(synk): top_k_acc helper is not defined in the source file; computed
    # here as the mean top-k hit rate over all token positions.
    top_k_val = topk_sum / jnp.maximum(tok_cnt, 1.0)

    pred_ids = pred_flat.reshape(B, S)

    # ---- per-row "corrects" over task-mask positions ----
    eq = (pred_ids == out_ids)
    corrects = jnp.where(out_task_mask, eq, True).astype(jnp.int32)
    if config.get('concat', False):
        corrects_out = corrects.sum(-1) / corrects.shape[-1]
    else:
        corrects_out = corrects.sum(-1) == corrects.shape[-1]

    ret = {
        'pred_ids': pred_ids,
        'loss': loss,
        'acc': acc,
        'corrects': corrects_out,
        'top_k': top_k_val,
    }
    if return_logits:
        ret['logits'] = logits2d.reshape(B, S, -1)
    return ret


if __name__ == "__main__":
    key = jax.random.PRNGKey(0)
    B, S, H, V = 2, 8, 32, 32
    k_emb, k_w, k_in, k_out = jax.random.split(key, 4)

    emb = 0.5 * jax.random.normal(k_emb, (V, H), jnp.float32)
    w_out = 0.2 * jax.random.normal(k_w, (H, V), jnp.float32)
    b_out = jnp.zeros((1, V), jnp.float32)
    # one-time prep: bf16 embedding, bf16 pre-padded vocab projection
    params = prepare_loss_params(emb, w_out, b_out, block_v=1024)

    # token ids avoid pad/bos/eos (0/1/2); identical pad masks for input/output
    input_ids = jax.random.randint(k_in, (B, S), 3, V, dtype=jnp.int32)
    output_ids = jax.random.randint(k_out, (B, S), 3, V, dtype=jnp.int32)
    pad_mask = jnp.zeros((B, S), dtype=bool).at[:, -2:].set(True)

    data = {
        'input_ids': input_ids,
        'output_ids': output_ids,
        'input_pad_mask': pad_mask,
        'output_pad_mask': pad_mask,
    }

    ret = loss_wrapper_forward(params, data, config={}, top_k=5)
    jax.block_until_ready(ret)

    assert ret['logits'].shape == (B, S, V)
    assert ret['pred_ids'].shape == (B, S)
    assert ret['loss'].shape == ()
    assert ret['acc'].shape == ()
    assert ret['corrects'].shape == (B,)
    assert bool(jnp.isfinite(ret['loss'])) and bool(jnp.isfinite(ret['acc']))
    assert bool(jnp.isfinite(ret['top_k']))
    assert float(ret['top_k']) >= 0.0 and float(ret['top_k']) <= 1.0

    # reference check (same bf16 operand casts the kernel feeds the MXU)
    h_ref = jnp.tanh(params['emb'][input_ids].astype(jnp.float32)
                     ).astype(jnp.bfloat16).reshape(B * S, H)
    logits_ref = (jnp.dot(h_ref, params['w_out'],
                          preferred_element_type=jnp.float32)
                  + params['b_out'])[:, :V]
    logp = jax.nn.log_softmax(logits_ref, axis=-1)
    nll = -jnp.take_along_axis(logp, output_ids.reshape(-1, 1), axis=-1)[:, 0]
    vmask = (~pad_mask).reshape(-1).astype(jnp.float32)
    loss_ref = (nll * vmask).sum() / vmask.sum()
    assert abs(float(ret['loss']) - float(loss_ref)) < 1e-3, (ret['loss'], loss_ref)

    # kernel argmax vs XLA argmax (allow rare ulp-level tie flips)
    pred_ref = jnp.argmax(logits_ref, axis=-1).reshape(B, S)
    match_frac = float(jnp.mean((ret['pred_ids'] == pred_ref).astype(jnp.float32)))
    assert match_frac >= 0.9, match_frac

    # kernel accuracy is self-consistent with the kernel's own predictions
    acc_self = float(((ret['pred_ids'] == output_ids) & (~pad_mask)).sum()
                     / vmask.sum())
    assert abs(float(ret['acc']) - acc_self) < 1e-5, (ret['acc'], acc_self)

    print("KERNEL_OK")
</pallas_src>

<mosaic_0001>
module attributes {stable_mosaic.version = 11 : i64} {
  func.func @_loss_head_kernel(%arg0: i32, %arg1: i32, %arg2: memref<16x1xi32, #tpu.memory_space<vmem>>, %arg3: memref<16x1xf32, #tpu.memory_space<vmem>>, %arg4: memref<16x1xf32, #tpu.memory_space<vmem>>, %arg5: memref<16x32xbf16, #tpu.memory_space<vmem>>, %arg6: memref<32x128xbf16, #tpu.memory_space<vmem>>, %arg7: memref<1x128xf32, #tpu.memory_space<vmem>>, %arg8: memref<16x128xbf16, #tpu.memory_space<vmem>>, %arg9: memref<16x1xi32, #tpu.memory_space<vmem>>, %arg10: memref<1x1x128xf32, #tpu.memory_space<vmem>>, %arg11: memref<16x1xf32, #tpu.memory_space<vmem>>, %arg12: memref<16x1xf32, #tpu.memory_space<vmem>>, %arg13: memref<16x1xf32, #tpu.memory_space<vmem>>, %arg14: memref<16x1xf32, #tpu.memory_space<vmem>>, %arg15: memref<16x1xf32, #tpu.memory_space<vmem>>, %arg16: memref<16x1xf32, #tpu.memory_space<vmem>>) attributes {dimension_semantics = [#tpu.dimension_semantics<parallel>, #tpu.dimension_semantics<arbitrary>], iteration_bounds = array<i64: 1, 1>, scalar_prefetch = 0 : i64, scratch_operands = 6 : i64, tpu.core_type = #tpu.core_type<tc>, window_params = [{transform_indices = @transform_0, window_bounds = array<i64: 16, 1>}, {transform_indices = @transform_1, window_bounds = array<i64: 16, 1>}, {transform_indices = @transform_2, window_bounds = array<i64: 16, 1>}, {transform_indices = @transform_3, window_bounds = array<i64: 16, 32>}, {transform_indices = @transform_4, window_bounds = array<i64: 32, 128>}, {transform_indices = @transform_5, window_bounds = array<i64: 1, 128>}, {transform_indices = @transform_6, window_bounds = array<i64: 16, 128>}, {transform_indices = @transform_7, window_bounds = array<i64: 16, 1>}, {transform_indices = @transform_8, window_bounds = array<i64: 1, 1, 128>}]} {
    %c0_i32 = arith.constant 0 : i32
    %0 = arith.cmpi eq, %arg1, %c0_i32 : i32
    %1 = arith.extui %0 : i1 to i32
    %c0_i32_0 = arith.constant 0 : i32
    %2 = arith.cmpi ne, %1, %c0_i32_0 : i32
    scf.if %2 {
      %cst_52 = arith.constant -1.000000e+30 : f32
      %80 = vector.broadcast %cst_52 : f32 to vector<16x1xf32>
      %c0_53 = arith.constant 0 : index
      %c0_54 = arith.constant 0 : index
      %81 = vector.load %arg11[%c0_53, %c0_54] : memref<16x1xf32, #tpu.memory_space<vmem>>, vector<16x1xf32>
      tpu.vector_store %arg11[%c0_53, %c0_54], %80 {strides = array<i32>} : memref<16x1xf32, #tpu.memory_space<vmem>>, vector<16x1xf32>,
      %cst_55 = arith.constant 0.000000e+00 : f32
      %82 = vector.broadcast %cst_55 : f32 to vector<16x1xf32>
      %c0_56 = arith.constant 0 : index
      %c0_57 = arith.constant 0 : index
      %83 = vector.load %arg12[%c0_56, %c0_57] : memref<16x1xf32, #tpu.memory_space<vmem>>, vector<16x1xf32>
      tpu.vector_store %arg12[%c0_56, %c0_57], %82 {strides = array<i32>} : memref<16x1xf32, #tpu.memory_space<vmem>>, vector<16x1xf32>,
      %cst_58 = arith.constant 0.000000e+00 : f32
      %84 = vector.broadcast %cst_58 : f32 to vector<16x1xf32>
      %c0_59 = arith.constant 0 : index
      %c0_60 = arith.constant 0 : index
      %85 = vector.load %arg13[%c0_59, %c0_60] : memref<16x1xf32, #tpu.memory_space<vmem>>, vector<16x1xf32>
      tpu.vector_store %arg13[%c0_59, %c0_60], %84 {strides = array<i32>} : memref<16x1xf32, #tpu.memory_space<vmem>>, vector<16x1xf32>,
      %cst_61 = arith.constant 0.000000e+00 : f32
      %86 = vector.broadcast %cst_61 : f32 to vector<16x1xf32>
      %c0_62 = arith.constant 0 : index
      %c0_63 = arith.constant 0 : index
      %87 = vector.load %arg14[%c0_62, %c0_63] : memref<16x1xf32, #tpu.memory_space<vmem>>, vector<16x1xf32>
      tpu.vector_store %arg14[%c0_62, %c0_63], %86 {strides = array<i32>} : memref<16x1xf32, #tpu.memory_space<vmem>>, vector<16x1xf32>,
      %cst_64 = arith.constant 0.000000e+00 : f32
      %88 = vector.broadcast %cst_64 : f32 to vector<16x1xf32>
      %c0_65 = arith.constant 0 : index
      %c0_66 = arith.constant 0 : index
      %89 = vector.load %arg15[%c0_65, %c0_66] : memref<16x1xf32, #tpu.memory_space<vmem>>, vector<16x1xf32>
      tpu.vector_store %arg15[%c0_65, %c0_66], %88 {strides = array<i32>} : memref<16x1xf32, #tpu.memory_space<vmem>>, vector<16x1xf32>,
      %cst_67 = arith.constant 0.000000e+00 : f32
      %90 = vector.broadcast %cst_67 : f32 to vector<16x1xf32>
      %c0_68 = arith.constant 0 : index
      %c0_69 = arith.constant 0 : index
      %91 = vector.load %arg16[%c0_68, %c0_69] : memref<16x1xf32, #tpu.memory_space<vmem>>, vector<16x1xf32>
      tpu.vector_store %arg16[%c0_68, %c0_69], %90 {strides = array<i32>} : memref<16x1xf32, #tpu.memory_space<vmem>>, vector<16x1xf32>,
    } else {
    }
    %c0 = arith.constant 0 : index
    %c0_1 = arith.constant 0 : index
    %3 = vector.load %arg2[%c0, %c0_1] : memref<16x1xi32, #tpu.memory_space<vmem>>, vector<16x1xi32>
    %4 = arith.sitofp %3 : vector<16x1xi32> to vector<16x1xf32>
    %c0_2 = arith.constant 0 : index
    %c0_3 = arith.constant 0 : index
    %5 = vector.load %arg4[%c0_2, %c0_3] : memref<16x1xf32, #tpu.memory_space<vmem>>, vector<16x1xf32>
    %c0_4 = arith.constant 0 : index
    %c0_5 = arith.constant 0 : index
    %6 = vector.load %arg5[%c0_4, %c0_5] : memref<16x32xbf16, #tpu.memory_space<vmem>>, vector<16x32xbf16>
    %c0_6 = arith.constant 0 : index
    %c0_7 = arith.constant 0 : index
    %7 = vector.load %arg6[%c0_6, %c0_7] : memref<32x128xbf16, #tpu.memory_space<vmem>>, vector<32x128xbf16>
    %cst = arith.constant dense<0.000000e+00> : vector<16x128xf32>
    %8 = tpu.matmul %6, %7, %cst {dimension_numbers = #tpu.dot_dimension_numbers<[1], [0], [0], [1], [0, 0, 1, 1], [], []>} : vector<16x32xbf16>, vector<32x128xbf16>, vector<16x128xf32> -> vector<16x128xf32>
    %c0_8 = arith.constant 0 : index
    %c0_9 = arith.constant 0 : index
    %9 = vector.load %arg7[%c0_8, %c0_9] : memref<1x128xf32, #tpu.memory_space<vmem>>, vector<1x128xf32>
    %10 = vector.broadcast %9 : vector<1x128xf32> to vector<16x128xf32>
    %11 = arith.addf %8, %10 : vector<16x128xf32>
    %12 = arith.truncf %11 : vector<16x128xf32> to vector<16x128xbf16>
    %c0_10 = arith.constant 0 : index
    %c0_11 = arith.constant 0 : index
    %13 = vector.load %arg8[%c0_10, %c0_11] : memref<16x128xbf16, #tpu.memory_space<vmem>>, vector<16x128xbf16>
    tpu.vector_store %arg8[%c0_10, %c0_11], %12 {strides = array<i32>} : memref<16x128xbf16, #tpu.memory_space<vmem>>, vector<16x128xbf16>,
    %14 = tpu.iota {dimensions = array<i32: 1>} : vector<16x128xi32>
    %c128_i32 = arith.constant 128 : i32
    %15 = arith.muli %arg1, %c128_i32 : i32
    %16 = vector.broadcast %15 : i32 to vector<16x128xi32>
    %17 = arith.addi %14, %16 : vector<16x128xi32>
    %18 = arith.sitofp %17 : vector<16x128xi32> to vector<16x128xf32>
    %cst_12 = arith.constant 3.200000e+01 : f32
    %19 = vector.broadcast %cst_12 : f32 to vector<16x128xf32>
    %20 = arith.cmpf olt, %18, %19 : vector<16x128xf32>
    %cst_13 = arith.constant -1.000000e+30 : f32
    %21 = vector.broadcast %cst_13 : f32 to vector<16x128xf32>
    %22 = arith.select %20, %11, %21 : vector<16x128xi1>, vector<16x128xf32>
    %c0_14 = arith.constant 0 : index
    %c0_15 = arith.constant 0 : index
    %23 = vector.load %arg13[%c0_14, %c0_15] : memref<16x1xf32, #tpu.memory_space<vmem>>, vector<16x1xf32>
    %cst_16 = arith.constant 0.000000e+00 : f32
    %24 = vector.broadcast %cst_16 : f32 to vector<16x128xf32>
    %25 = arith.select %20, %11, %24 : vector<16x128xi1>, vector<16x128xf32>
    %cst_17 = arith.constant dense<0.000000e+00> : vector<16xf32>
    %26 = vector.multi_reduction <add>, %25, %cst_17 [1] : vector<16x128xf32> to vector<16xf32>
    %27 = vector.shape_cast %26 : vector<16xf32> to vector<16x1xf32>
    %28 = arith.addf %23, %27 : vector<16x1xf32>
    %c0_18 = arith.constant 0 : index
    %c0_19 = arith.constant 0 : index
    %29 = vector.load %arg13[%c0_18, %c0_19] : memref<16x1xf32, #tpu.memory_space<vmem>>, vector<16x1xf32>
    tpu.vector_store %arg13[%c0_18, %c0_19], %28 {strides = array<i32>} : memref<16x1xf32, #tpu.memory_space<vmem>>, vector<16x1xf32>,
    %cst_20 = arith.constant dense<0xFF800000> : vector<16xf32>
    %30 = vector.multi_reduction <maximumf>, %22, %cst_20 [1] : vector<16x128xf32> to vector<16xf32>
    %31 = vector.shape_cast %30 : vector<16xf32> to vector<16x1xf32>
    %32 = vector.broadcast %31 : vector<16x1xf32> to vector<16x128xf32>
    %33 = arith.cmpf oeq, %22, %32 : vector<16x128xf32>
    %cst_21 = arith.constant 1.280000e+02 : f32
    %34 = vector.broadcast %cst_21 : f32 to vector<16x128xf32>
    %35 = arith.select %33, %18, %34 : vector<16x128xi1>, vector<16x128xf32>
    %cst_22 = arith.constant dense<0x7F800000> : vector<16xf32>
    %36 = vector.multi_reduction <minimumf>, %35, %cst_22 [1] : vector<16x128xf32> to vector<16xf32>
    %37 = vector.shape_cast %36 : vector<16xf32> to vector<16x1xf32>
    %c0_23 = arith.constant 0 : index
    %c0_24 = arith.constant 0 : index
    %38 = vector.load %arg11[%c0_23, %c0_24] : memref<16x1xf32, #tpu.memory_space<vmem>>, vector<16x1xf32>
    %39 = arith.cmpf ogt, %31, %38 : vector<16x1xf32>
    %c0_25 = arith.constant 0 : index
    %c0_26 = arith.constant 0 : index
    %40 = vector.load %arg16[%c0_25, %c0_26] : memref<16x1xf32, #tpu.memory_space<vmem>>, vector<16x1xf32>
    %41 = arith.select %39, %37, %40 : vector<16x1xi1>, vector<16x1xf32>
    %c0_27 = arith.constant 0 : index
    %c0_28 = arith.constant 0 : index
    %42 = vector.load %arg16[%c0_27, %c0_28] : memref<16x1xf32, #tpu.memory_space<vmem>>, vector<16x1xf32>
    tpu.vector_store %arg16[%c0_27, %c0_28], %41 {strides = array<i32>} : memref<16x1xf32, #tpu.memory_space<vmem>>, vector<16x1xf32>,
    %43 = arith.maximumf %38, %31 : vector<16x1xf32>
    %c0_29 = arith.constant 0 : index
    %c0_30 = arith.constant 0 : index
    %44 = vector.load %arg12[%c0_29, %c0_30] : memref<16x1xf32, #tpu.memory_space<vmem>>, vector<16x1xf32>
    %45 = arith.subf %38, %43 : vector<16x1xf32>
    %46 = math.exp %45 : vector<16x1xf32>
    %47 = arith.mulf %44, %46 : vector<16x1xf32>
    %48 = vector.broadcast %43 : vector<16x1xf32> to vector<16x128xf32>
    %49 = arith.subf %22, %48 : vector<16x128xf32>
    %50 = math.exp %49 : vector<16x128xf32>
    %cst_31 = arith.constant dense<0.000000e+00> : vector<16xf32>
    %51 = vector.multi_reduction <add>, %50, %cst_31 [1] : vector<16x128xf32> to vector<16xf32>
    %52 = vector.shape_cast %51 : vector<16xf32> to vector<16x1xf32>
    %53 = arith.addf %47, %52 : vector<16x1xf32>
    %c0_32 = arith.constant 0 : index
    %c0_33 = arith.constant 0 : index
    %54 = vector.load %arg12[%c0_32, %c0_33] : memref<16x1xf32, #tpu.memory_space<vmem>>, vector<16x1xf32>
    tpu.vector_store %arg12[%c0_32, %c0_33], %53 {strides = array<i32>} : memref<16x1xf32, #tpu.memory_space<vmem>>, vector<16x1xf32>,
    %c0_34 = arith.constant 0 : index
    %c0_35 = arith.constant 0 : index
    %55 = vector.load %arg11[%c0_34, %c0_35] : memref<16x1xf32, #tpu.memory_space<vmem>>, vector<16x1xf32>
    tpu.vector_store %arg11[%c0_34, %c0_35], %43 {strides = array<i32>} : memref<16x1xf32, #tpu.memory_space<vmem>>, vector<16x1xf32>,
    %56 = vector.broadcast %4 : vector<16x1xf32> to vector<16x128xf32>
    %57 = arith.cmpf oeq, %18, %56 : vector<16x128xf32>
    %c0_36 = arith.constant 0 : index
    %c0_37 = arith.constant 0 : index
    %58 = vector.load %arg14[%c0_36, %c0_37] : memref<16x1xf32, #tpu.memory_space<vmem>>, vector<16x1xf32>
    %cst_38 = arith.constant 0.000000e+00 : f32
    %59 = vector.broadcast %cst_38 : f32 to vector<16x128xf32>
    %60 = arith.select %57, %11, %59 : vector<16x128xi1>, vector<16x128xf32>
    %cst_39 = arith.constant dense<0.000000e+00> : vector<16xf32>
    %61 = vector.multi_reduction <add>, %60, %cst_39 [1] : vector<16x128xf32> to vector<16xf32>
    %62 = vector.shape_cast %61 : vector<16xf32> to vector<16x1xf32>
    %63 = arith.addf %58, %62 : vector<16x1xf32>
    %c0_40 = arith.constant 0 : index
    %c0_41 = arith.constant 0 : index
    %64 = vector.load %arg14[%c0_40, %c0_41] : memref<16x1xf32, #tpu.memory_space<vmem>>, vector<16x1xf32>
    tpu.vector_store %arg14[%c0_40, %c0_41], %63 {strides = array<i32>} : memref<16x1xf32, #tpu.memory_space<vmem>>, vector<16x1xf32>,
    %65 = vector.broadcast %5 : vector<16x1xf32> to vector<16x128xf32>
    %66 = arith.cmpf ogt, %22, %65 : vector<16x128xf32>
    %cst_42 = arith.constant dense<true> : vector<16x128xi1>
    %67 = arith.xori %57, %cst_42 : vector<16x128xi1>
    %68 = arith.andi %66, %67 : vector<16x128xi1>
    %c0_43 = arith.constant 0 : index
    %c0_44 = arith.constant 0 : index
    %69 = vector.load %arg15[%c0_43, %c0_44] : memref<16x1xf32, #tpu.memory_space<vmem>>, vector<16x1xf32>
    %cst_45 = arith.constant 1.000000e+00 : f32
    %cst_46 = arith.constant 0.000000e+00 : f32
    %70 = vector.broadcast %cst_45 : f32 to vector<16x128xf32>
    %71 = vector.broadcast %cst_46 : f32 to vector<16x128xf32>
    %72 = arith.select %68, %70, %71 : vector<16x128xi1>, vector<16x128xf32>
    %cst_47 = arith.constant dense<0.000000e+00> : vector<16xf32>
    %73 = vector.multi_reduction <add>, %72, %cst_47 [1] : vector<16x128xf32> to vector<16xf32>
    %74 = vector.shape_cast %73 : vector<16xf32> to vector<16x1xf32>
    %75 = arith.addf %69, %74 : vector<16x1xf32>
    %c0_48 = arith.constant 0 : index
    %c0_49 = arith.constant 0 : index
    %76 = vector.load %arg15[%c0_48, %c0_49] : memref<16x1xf32, #tpu.memory_space<vmem>>, vector<16x1xf32>
    tpu.vector_store %arg15[%c0_48, %c0_49], %75 {strides = array<i32>} : memref<16x1xf32, #tpu.memory_space<vmem>>, vector<16x1xf32>,
    %c0_i32_50 = arith.constant 0 : i32
    %77 = arith.cmpi eq, %arg1, %c0_i32_50 : i32
    %78 = arith.extui %77 : i1 to i32
    %c0_i32_51 = arith.constant 0 : i32
    %79 = arith.cmpi ne, %78, %c0_i32_51 : i32
    scf.if %79 {
      %c0_52 = arith.constant 0 : index
      %c0_53 = arith.constant 0 : index
      %80 = vector.load %arg11[%c0_52, %c0_53] : memref<16x1xf32, #tpu.memory_space<vmem>>, vector<16x1xf32>
      %c0_54 = arith.constant 0 : index
      %c0_55 = arith.constant 0 : index
      %81 = vector.load %arg12[%c0_54, %c0_55] : memref<16x1xf32, #tpu.memory_space<vmem>>, vector<16x1xf32>
      %82 = math.log %81 : vector<16x1xf32>
      %83 = arith.addf %80, %82 : vector<16x1xf32>
      %c0_56 = arith.constant 0 : index
      %c0_57 = arith.constant 0 : index
      %84 = vector.load %arg14[%c0_56, %c0_57] : memref<16x1xf32, #tpu.memory_space<vmem>>, vector<16x1xf32>
      %85 = arith.subf %83, %84 : vector<16x1xf32>
      %c0_58 = arith.constant 0 : index
      %c0_59 = arith.constant 0 : index
      %86 = vector.load %arg13[%c0_58, %c0_59] : memref<16x1xf32, #tpu.memory_space<vmem>>, vector<16x1xf32>
      %cst_60 = arith.constant 3.125000e-02 : f32
      %87 = vector.broadcast %cst_60 : f32 to vector<16x1xf32>
      %88 = arith.mulf %86, %87 : vector<16x1xf32>
      %89 = arith.subf %83, %88 : vector<16x1xf32>
      %cst_61 = arith.constant 1.000000e+00 : f32
      %90 = vector.broadcast %cst_61 : f32 to vector<16x1xf32>
      %91 = arith.mulf %90, %85 : vector<16x1xf32>
      %cst_62 = arith.constant 0.000000e+00 : f32
      %92 = vector.broadcast %cst_62 : f32 to vector<16x1xf32>
      %93 = arith.mulf %92, %89 : vector<16x1xf32>
      %94 = arith.addf %91, %93 : vector<16x1xf32>
      %c0_63 = arith.constant 0 : index
      %c0_64 = arith.constant 0 : index
      %95 = vector.load %arg16[%c0_63, %c0_64] : memref<16x1xf32, #tpu.memory_space<vmem>>, vector<16x1xf32>
      %96 = arith.fptosi %95 : vector<16x1xf32> to vector<16x1xi32>
      %c0_65 = arith.constant 0 : index
      %c0_66 = arith.constant 0 : index
      %97 = vector.load %arg9[%c0_65, %c0_66] : memref<16x1xi32, #tpu.memory_space<vmem>>, vector<16x1xi32>
      tpu.vector_store %arg9[%c0_65, %c0_66], %96 {strides = array<i32>} : memref<16x1xi32, #tpu.memory_space<vmem>>, vector<16x1xi32>,
      %c0_67 = arith.constant 0 : index
      %c0_68 = arith.constant 0 : index
      %98 = vector.load %arg3[%c0_67, %c0_68] : memref<16x1xf32, #tpu.memory_space<vmem>>, vector<16x1xf32>
      %99 = tpu.iota {dimensions = array<i32: 0>} : vector<16x1xi32>
      %c16_i32 = arith.constant 16 : i32
      %100 = arith.muli %arg0, %c16_i32 : i32
      %101 = vector.broadcast %100 : i32 to vector<16x1xi32>
      %102 = arith.addi %99, %101 : vector<16x1xi32>
      %c16_i32_69 = arith.constant 16 : i32
      %103 = vector.broadcast %c16_i32_69 : i32 to vector<16x1xi32>
      %104 = arith.cmpi slt, %102, %103 : vector<16x1xi32>
      %105 = arith.extui %104 : vector<16x1xi1> to vector<16x1xi32>
      %106 = arith.sitofp %105 : vector<16x1xi32> to vector<16x1xf32>
      %107 = arith.cmpf oeq, %95, %4 : vector<16x1xf32>
      %108 = arith.extui %107 : vector<16x1xi1> to vector<16x1xi32>
      %109 = arith.sitofp %108 : vector<16x1xi32> to vector<16x1xf32>
      %c0_70 = arith.constant 0 : index
      %c0_71 = arith.constant 0 : index
      %110 = vector.load %arg15[%c0_70, %c0_71] : memref<16x1xf32, #tpu.memory_space<vmem>>, vector<16x1xf32>
      %cst_72 = arith.constant 5.000000e+00 : f32
      %111 = vector.broadcast %cst_72 : f32 to vector<16x1xf32>
      %112 = arith.cmpf olt, %110, %111 : vector<16x1xf32>
      %113 = arith.extui %112 : vector<16x1xi1> to vector<16x1xi32>
      %114 = arith.sitofp %113 : vector<16x1xi32> to vector<16x1xf32>
      %115 = arith.mulf %94, %98 : vector<16x1xf32>
      %cst_73 = arith.constant dense<0.000000e+00> : vector<1xf32>
      %116 = vector.multi_reduction <add>, %115, %cst_73 [0] : vector<16x1xf32> to vector<1xf32>
      %117 = vector.shape_cast %116 : vector<1xf32> to vector<1x1xf32>
      %cst_74 = arith.constant dense<0.000000e+00> : vector<1xf32>
      %118 = vector.multi_reduction <add>, %98, %cst_74 [0] : vector<16x1xf32> to vector<1xf32>
      %119 = vector.shape_cast %118 : vector<1xf32> to vector<1x1xf32>
      %120 = arith.mulf %109, %98 : vector<16x1xf32>
      %cst_75 = arith.constant dense<0.000000e+00> : vector<1xf32>
      %121 = vector.multi_reduction <add>, %120, %cst_75 [0] : vector<16x1xf32> to vector<1xf32>
      %122 = vector.shape_cast %121 : vector<1xf32> to vector<1x1xf32>
      %123 = arith.mulf %114, %106 : vector<16x1xf32>
      %cst_76 = arith.constant dense<0.000000e+00> : vector<1xf32>
      %124 = vector.multi_reduction <add>, %123, %cst_76 [0] : vector<16x1xf32> to vector<1xf32>
      %125 = vector.shape_cast %124 : vector<1xf32> to vector<1x1xf32>
      %cst_77 = arith.constant dense<0.000000e+00> : vector<1xf32>
      %126 = vector.multi_reduction <add>, %106, %cst_77 [0] : vector<16x1xf32> to vector<1xf32>
      %127 = vector.shape_cast %126 : vector<1xf32> to vector<1x1xf32>
      %128 = tpu.iota {dimensions = array<i32: 1>} : vector<1x128xi32>
      %c0_i32_78 = arith.constant 0 : i32
      %129 = vector.broadcast %c0_i32_78 : i32 to vector<1x128xi32>
      %130 = arith.cmpi eq, %128, %129 : vector<1x128xi32>
      %cst_79 = arith.constant 0.000000e+00 : f32
      %131 = vector.shape_cast %117 : vector<1x1xf32> to vector<1x1xf32>
      %132 = vector.broadcast %131 : vector<1x1xf32> to vector<1x128xf32>
      %133 = vector.broadcast %cst_79 : f32 to vector<1x128xf32>
      %134 = arith.select %130, %132, %133 : vector<1x128xi1>, vector<1x128xf32>
      %c1_i32 = arith.constant 1 : i32
      %135 = vector.broadcast %c1_i32 : i32 to vector<1x128xi32>
      %136 = arith.cmpi eq, %128, %135 : vector<1x128xi32>
      %cst_80 = arith.constant 0.000000e+00 : f32
      %137 = vector.shape_cast %119 : vector<1x1xf32> to vector<1x1xf32>
      %138 = vector.broadcast %137 : vector<1x1xf32> to vector<1x128xf32>
      %139 = vector.broadcast %cst_80 : f32 to vector<1x128xf32>
      %140 = arith.select %136, %138, %139 : vector<1x128xi1>, vector<1x128xf32>
      %141 = arith.addf %134, %140 : vector<1x128xf32>
      %c2_i32 = arith.constant 2 : i32
      %142 = vector.broadcast %c2_i32 : i32 to vector<1x128xi32>
      %143 = arith.cmpi eq, %128, %142 : vector<1x128xi32>
      %cst_81 = arith.constant 0.000000e+00 : f32
      %144 = vector.shape_cast %122 : vector<1x1xf32> to vector<1x1xf32>
      %145 = vector.broadcast %144 : vector<1x1xf32> to vector<1x128xf32>
      %146 = vector.broadcast %cst_81 : f32 to vector<1x128xf32>
      %147 = arith.select %143, %145, %146 : vector<1x128xi1>, vector<1x128xf32>
      %148 = arith.addf %141, %147 : vector<1x128xf32>
      %c3_i32 = arith.constant 3 : i32
      %149 = vector.broadcast %c3_i32 : i32 to vector<1x128xi32>
      %150 = arith.cmpi eq, %128, %149 : vector<1x128xi32>
      %cst_82 = arith.constant 0.000000e+00 : f32
      %151 = vector.shape_cast %125 : vector<1x1xf32> to vector<1x1xf32>
      %152 = vector.broadcast %151 : vector<1x1xf32> to vector<1x128xf32>
      %153 = vector.broadcast %cst_82 : f32 to vector<1x128xf32>
      %154 = arith.select %150, %152, %153 : vector<1x128xi1>, vector<1x128xf32>
      %155 = arith.addf %148, %154 : vector<1x128xf32>
      %c4_i32 = arith.constant 4 : i32
      %156 = vector.broadcast %c4_i32 : i32 to vector<1x128xi32>
      %157 = arith.cmpi eq, %128, %156 : vector<1x128xi32>
      %cst_83 = arith.constant 0.000000e+00 : f32
      %158 = vector.shape_cast %127 : vector<1x1xf32> to vector<1x1xf32>
      %159 = vector.broadcast %158 : vector<1x1xf32> to vector<1x128xf32>
      %160 = vector.broadcast %cst_83 : f32 to vector<1x128xf32>
      %161 = arith.select %157, %159, %160 : vector<1x128xi1>, vector<1x128xf32>
      %162 = arith.addf %155, %161 : vector<1x128xf32>
      %163 = vector.shape_cast %162 : vector<1x128xf32> to vector<1x1x128xf32>
      %c0_84 = arith.constant 0 : index
      %c0_85 = arith.constant 0 : index
      %c0_86 = arith.constant 0 : index
      %164 = vector.load %arg10[%c0_84, %c0_85, %c0_86] : memref<1x1x128xf32, #tpu.memory_space<vmem>>, vector<1x1x128xf32>
      tpu.vector_store %arg10[%c0_84, %c0_85, %c0_86], %163 {strides = array<i32>} : memref<1x1x128xf32, #tpu.memory_space<vmem>>, vector<1x1x128xf32>,
    } else {
    }
    return
  }
  func.func @transform_0(%arg0: i32, %arg1: i32) -> (i32, i32) {
    %c0_i32 = arith.constant 0 : i32
    %c0_i32_0 = arith.constant 0 : i32
    return %arg0, %c0_i32 : i32, i32
  }
  func.func @transform_1(%arg0: i32, %arg1: i32) -> (i32, i32) {
    %c0_i32 = arith.constant 0 : i32
    %c0_i32_0 = arith.constant 0 : i32
    return %arg0, %c0_i32 : i32, i32
  }
  func.func @transform_2(%arg0: i32, %arg1: i32) -> (i32, i32) {
    %c0_i32 = arith.constant 0 : i32
    %c0_i32_0 = arith.constant 0 : i32
    return %arg0, %c0_i32 : i32, i32
  }
  func.func @transform_3(%arg0: i32, %arg1: i32) -> (i32, i32) {
    %c0_i32 = arith.constant 0 : i32
    %c0_i32_0 = arith.constant 0 : i32
    return %arg0, %c0_i32 : i32, i32
  }
  func.func @transform_4(%arg0: i32, %arg1: i32) -> (i32, i32) {
    %c0_i32 = arith.constant 0 : i32
    %c0_i32_0 = arith.constant 0 : i32
    return %c0_i32, %arg1 : i32, i32
  }
  func.func @transform_5(%arg0: i32, %arg1: i32) -> (i32, i32) {
    %c0_i32 = arith.constant 0 : i32
    %c0_i32_0 = arith.constant 0 : i32
    return %c0_i32, %arg1 : i32, i32
  }
  func.func @transform_6(%arg0: i32, %arg1: i32) -> (i32, i32) {
    %c0_i32 = arith.constant 0 : i32
    return %arg0, %arg1 : i32, i32
  }
  func.func @transform_7(%arg0: i32, %arg1: i32) -> (i32, i32) {
    %c0_i32 = arith.constant 0 : i32
    %c0_i32_0 = arith.constant 0 : i32
    return %arg0, %c0_i32 : i32, i32
  }
  func.func @transform_8(%arg0: i32, %arg1: i32) -> (i32, i32, i32) {
    %c0_i32 = arith.constant 0 : i32
    %c0_i32_0 = arith.constant 0 : i32
    %c0_i32_1 = arith.constant 0 : i32
    return %arg0, %c0_i32, %c0_i32_0 : i32, i32, i32
  }
}

</mosaic_0001>

<bundles_post_ra>
// kernel: tpu_custom_call.1
= control target key start
LH: loop header
LB: loop body
LE: loop exit
PB: predicated region body
PF: predicated region fallthrough
CT: control target
= control target key end

     0   :  { %14 = vsyncpa [#allocation9], 0  ;;  %v559_v1 = vmov 0.0   ;;  %vm560_vm0 = vmmov 0   ;;  %s846_s0 = inlined_call_operand.vmem [shape: s32[16,1], index: 0, kind: input, shape index: {}]   ;;  %s847_s1 = inlined_call_operand.vmem [shape: f32[16,1], index: 1, kind: input, shape index: {}]   ;;  %s848_s2 = inlined_call_operand.vmem [shape: f32[16,1], index: 2, kind: input, shape index: {}]   ;;  %s849_s3 = inlined_call_operand.vmem [shape: bf16[16,32], index: 3, kind: input, shape index: {}]   ;;  %s850_s4 = inlined_call_operand.vmem [shape: bf16[32,128], index: 4, kind: input, shape index: {}]   ;;  %s851_s5 = inlined_call_operand.vmem [shape: f32[1,128], index: 5, kind: input, shape index: {}]   ;;  %s852_s6 = inlined_call_operand.hbm [shape: bf16[16,128], index: 6, kind: output, shape index: {0}]   ;;  %s853_s7 = inlined_call_operand.vmem [shape: s32[16,1], index: 7, kind: output, shape index: {1}]   ;;  %s854_s8 = inlined_call_operand.hbm [shape: f32[1,1,128], index: 8, kind: output, shape index: {2}]  }
   0x1   :  { %v496_v0 = vld [vmem:[%s850_s4] sm:$0xff]   ;;  %472 = vmatprep.subr.bf16.mxu0 %v559_v1  ;;  %v497_v2 = vld [vmem:[%s850_s4 + $0x8] sm:$0xff]   ;;  %476 = vmatprep.mubr.msk.bf16.mxu0 %vm560_vm0, %v559_v1 }
   0x2   :  { %473 = vmatpush3.bf16.msra.mxu0 %v496_v0 }
   0x3   :  { %474 = vmatprep.subr.bf16.mxu0 %v559_v1 }
   0x4   :  { %15 = vsyncpa [#allocation11], 0  ;;  %v498_v3 = vld [vmem:[%s849_s3] sm:$0xff]   ;;  %vm82_vm1 = vcmask 261120   ;;  %v561_v4 = vmov 0   ;;  %v137_v5 = vlaneseq  ;;  %vm33_vm3 = vcmask 7168  }
   0x5   :  { %495 = vset.pattern.permute.xlu0 %v561_v4  ;;  %494 = vset.pattern.permute.xlu1 %v561_v4  ;;  %v451_v8 = vld [vmem:[%s851_s5] ss:$0 sm:$0xff]  ;;  %v562_v18 = vmov -1e+30   ;;  %36 = vst.msk [vmem:[#allocation3] sm:$0xff] %vm33_vm3, %v559_v1  ;;  %37 = vst.msk [vmem:[#allocation3 + $0x8] sm:$0xff] %vm33_vm3, %v559_v1 }
   0x6   :  { %475 = vmatpush3.bf16.msra.mxu0 %v497_v2  ;;  %v626_v6 = vand.u32 127, %v137_v5  ;;  %34 = vst.msk [vmem:[#allocation2] sm:$0xff] %vm33_vm3, %v562_v18  ;;  %35 = vst.msk [vmem:[#allocation2 + $0x8] sm:$0xff] %vm33_vm3, %v562_v18  ;;  %v678_v19 = vld [vmem:[%s846_s0] sm:$0xff]  ;;  %v705_v27 = vld [vmem:[%s846_s0 + $0x8] sm:$0xff]  ;;  %vm563_vm8 = vmmov 1  }
   0x7   :  { %38 = vst.msk [vmem:[#allocation4] sm:$0xff] %vm33_vm3, %v559_v1  ;;  %39 = vst.msk [vmem:[#allocation4 + $0x8] sm:$0xff] %vm33_vm3, %v559_v1  ;;  %v48_v20 = vcvt.s32.f32 %v678_v19  ;;  %v49_v30 = vcvt.s32.f32 %v705_v27  ;;  %v50_v31 = vld [vmem:[%s848_s2] sm:$0xff]  ;;  %v51_v32 = vld [vmem:[%s848_s2 + $0x8] sm:$0xff] }
   0x8   :  { %v629_v7 = vcvt.s32.f32 %v626_v6  ;;  %40 = vst.msk [vmem:[#allocation5] sm:$0xff] %vm33_vm3, %v559_v1  ;;  %41 = vst.msk [vmem:[#allocation5 + $0x8] sm:$0xff] %vm33_vm3, %v559_v1  ;;  %v732_v41 = vld [vmem:[%s847_s1] sm:$0xff]  ;;  %v737_v42 = vld [vmem:[%s847_s1 + $0x8] sm:$0xff] }
   0x9   :  { %477 = vmatmul.mubr.msk.bf16.vlgmr.msra.gmra.mrb[0].mxu0 %vm82_vm1, %v498_v3  ;;  %42 = vst.msk [vmem:[#allocation6] sm:$0xff] %vm33_vm3, %v559_v1  ;;  %43 = vst.msk [vmem:[#allocation6 + $0x8] sm:$0xff] %vm33_vm3, %v559_v1  ;;  %v344_v44 = vsel %vm33_vm3, %v732_v41, 0.0  ;;  %v345_v45 = vsel %vm33_vm3, %v737_v42, 0.0 }
   0xa   :  { %vm143_vm2 = vcmp.lt.f32.partialorder %v629_v7, 32.0  ;;  %44 = vst.msk [vmem:[#allocation7] sm:$0xff] %vm33_vm3, %v559_v1  ;;  %45 = vst.msk [vmem:[#allocation7 + $0x8] sm:$0xff] %vm33_vm3, %v559_v1  ;;  %v346_v47 = vadd.f32 %v345_v45, %v344_v44 }
   0xc   :  { %v347_v51 = vrot.slane %v346_v47, 4  ;;  %v183_v4 = vld [vmem:[#allocation3] sm:$0xff] }
   0xd   :  { %v683_v21 = vld [vmem:[#allocation2] sm:$0xff]  ;;  %v693_v24 = vld [vmem:[#allocation2 + $0x8] sm:$0xff] }
   0xe   :  { %v348_v54 = vadd.f32 %v347_v51, %v346_v47  ;;  %v147_v18 = vld [vmem:[#allocation4 + $0x8] sm:$0xff] }
  0x10   :  { %v349_v56 = vrot.slane %v348_v54, 2 }
  0x12   :  { %v350_v58 = vadd.f32 %v349_v56, %v348_v54 }
  0x14   :  { %v351_v60 = vrot.slane %v350_v58, 1 }
  0x16   :  { %v352_v62 = vadd.f32 %v351_v60, %v350_v58 }
  0xdc   :  { %v120_v9 = vpop.f32.mrb[0].mxu0 }
  0xdd   :  { %v635_v10 = vadd.f32 %v451_v8, %v120_v9  ;;  %v478_v11 = vpop.f32.mrb[1].mxu0  ;;  %v184_v9 = vld [vmem:[#allocation3 + $0x8] sm:$0xff] }
  0xde   :  { %v123_v12 = vpop.f32.mrb[2].mxu0  ;;  %v146_v11 = vld [vmem:[#allocation4] sm:$0xff] }
  0xdf   :  { %v637_v13 = vadd.f32 %v451_v8, %v123_v12  ;;  %v479_v14 = vpop.f32.mrb[3].mxu0  ;;  %v642_v15 = vsel %vm143_vm2, %v635_v10, -1e+30  ;;  %v148_v49 = vsel %vm143_vm2, %v635_v10, 0.0 }
  0xe0   :  { %159 = vmax.xlane.f32.xlu0 %v642_v15 }
  0xe1   :  { %v467_v16 = vpack.c.bf16 %v637_v13, %v635_v10  ;;  %v650_v17 = vsel %vm143_vm2, %v637_v13, -1e+30  ;;  %v149_v52 = vsel %vm143_vm2, %v637_v13, 0.0 }
  0xe3   :  { %468 = vst [vmem:[#allocation8] sm:$0xff] %v467_v16  }
  0xe4   :  { %161 = vmax.xlane.f32.xlu0 %v650_v17 }
  0xfa   :  { %221 = vperm.xlu0 %495, %v48_v20  }
 0x16d   :  { %v685_v22 = vpop.xlane.xlu0 %159 }
 0x16e   :  { %vm173_vm4 = vcmp.gt.f32.partialorder %v685_v22, %v683_v21  ;;  %v691_v23 = vmax.f32 %v683_v21, %v685_v22  ;;  %vm163_vm12 = vcmp.eq.f32.partialorder %v642_v15, %v685_v22 }
 0x16f   :  { %v165_v59 = vsel %vm163_vm12, %v629_v7, 128.0 }
 0x170   :  { %v185_v25 = vsub.f32 %v683_v21, %v691_v23  ;;  %217 = vst.msk [vmem:[#allocation2] sm:$0xff] %vm33_vm3, %v691_v23  ;;  %195 = vperm.xlu1 %494, %v691_v23  }
 0x171   :  { %v700_v26 = vpop.xlane.xlu0 %161 }
 0x172   :  { %vm174_vm5 = vcmp.gt.f32.partialorder %v700_v26, %v693_v24  ;;  %v711_v28 = vmax.f32 %v693_v24, %v700_v26  ;;  %vm164_vm13 = vcmp.eq.f32.partialorder %v650_v17, %v700_v26  ;;  %v187_v0 = vmul.f32 1.442695, %v185_v25 }
 0x173   :  { %v166_v61 = vsel %vm164_vm13, %v629_v7, 128.0 }
 0x174   :  { %v186_v29 = vsub.f32 %v693_v24, %v711_v28  ;;  %218 = vst.msk [vmem:[#allocation2 + $0x8] sm:$0xff] %vm33_vm3, %v711_v28  ;;  %200 = vperm.xlu1 %494, %v711_v28  }
 0x176   :  { %v189_v2 = vmul.f32 1.442695, %v186_v29 }
 0x178   :  { %226 = vperm.xlu1 %494, %v49_v30  }
 0x179   :  { %v222_v50 = vpop.permute.xlu0 %221 }
 0x17a   :  { %vm229_vm11 = vcmp.eq.f32.partialorder %v629_v7, %v222_v50 }
 0x17b   :  { %v233_v55 = vsel %vm229_vm11, %v635_v10, 0.0  ;;  %vm255_vm14 = vmxor %vm229_vm11, %vm563_vm8  ;;  %v275_v56 = vld [vmem:[#allocation2 + $0x8] sm:$0xff] }
 0x17c   :  { %245 = vperm.xlu1 %494, %v50_v31   ;;  %v231_v31 = vld [vmem:[#allocation5] sm:$0xff] }
 0x180   :  { %250 = vperm.xlu1 %494, %v51_v32  }
 0x1ef   :  { %v196_v33 = vpop.permute.xlu1 %195 }
 0x1f0   :  { %v203_v34 = vsub.f32 %v642_v15, %v196_v33 }
 0x1f2   :  { %v205_v35 = vmul.f32 1.442695, %v203_v34 }
 0x1f3   :  { %v201_v36 = vpop.permute.xlu1 %200 }
 0x1f4   :  { %499 = vpow2.f32 %v205_v35  ;;  %v204_v37 = vsub.f32 %v650_v17, %v201_v36  ;;  %v232_v35 = vld [vmem:[#allocation5 + $0x8] sm:$0xff] }
 0x1f6   :  { %v207_v38 = vmul.f32 1.442695, %v204_v37 }
 0x1f7   :  { %v227_v39 = vpop.permute.xlu1 %226 }
 0x1f8   :  { %501 = vpow2.f32 %v207_v38  ;;  %vm230_vm6 = vcmp.eq.f32.partialorder %v629_v7, %v227_v39  ;;  %v175_v39 = vld [vmem:[#allocation7] sm:$0xff] }
 0x1f9   :  { %vm256_vm9 = vmxor %vm230_vm6, %vm563_vm8  ;;  %v234_v57 = vsel %vm230_vm6, %v637_v13, 0.0  ;;  %503 = vpow2.f32 %v187_v0 }
 0x1fa   :  { %505 = vpow2.f32 %v189_v2 }
 0x1fb   :  { %v246_v40 = vpop.permute.xlu1 %245 }
 0x1fc   :  { %vm253_vm15 = vcmp.gt.f32.partialorder %v642_v15, %v246_v40 }
 0x1fd   :  { %vm257_vm0 = vmand %vm253_vm15, %vm255_vm14 }
 0x1fe   :  { %v500_v43 = vpop.eup %499  ;;  %v261_v63 = vsel %vm257_vm0, 1.0, %v559_v1 }
 0x1ff   :  { %209 = vadd.xlane.f32.xlu1 %v500_v43  ;;  %v251_v46 = vpop.permute.xlu1 %250 }
 0x200   :  { %vm254_vm7 = vcmp.gt.f32.partialorder %v650_v17, %v251_v46  ;;  %v260_v17 = vld [vmem:[#allocation6 + $0x8] sm:$0xff]  ;;  %v176_v46 = vld [vmem:[#allocation7 + $0x8] sm:$0xff] }
 0x201   :  { %vm258_vm10 = vmand %vm254_vm7, %vm256_vm9 }
 0x202   :  { %v502_v48 = vpop.eup %501  ;;  %v262_v53 = vsel %vm258_vm10, 1.0, %v559_v1 }
 0x203   :  { %150 = vadd.xlane.f32.xlu1 %v148_v49  ;;  %211 = vadd.xlane.f32.xlu0 %v502_v48  ;;  %v504_v3 = vpop.eup %503  ;;  %v274_v48 = vld [vmem:[#allocation2] sm:$0xff] }
 0x204   :  { %v191_v5 = vmul.f32 %v504_v3, %v183_v4  ;;  %v506_v7 = vpop.eup %505 }
 0x205   :  { %v192_v12 = vmul.f32 %v506_v7, %v184_v9 }
 0x207   :  { %152 = vadd.xlane.f32.xlu1 %v149_v52  ;;  %265 = vadd.xlane.f32.xlu0 %v262_v53 }
 0x20b   :  { %235 = vadd.xlane.f32.xlu1 %v233_v55  ;;  %v259_v55 = vld [vmem:[#allocation6] sm:$0xff] }
 0x20f   :  { %237 = vadd.xlane.f32.xlu1 %v234_v57 }
 0x213   :  { %167 = vmin.xlane.f32.xlu1 %v165_v59 }
 0x217   :  { %169 = vmin.xlane.f32.xlu1 %v166_v61 }
 0x21b   :  { %263 = vadd.xlane.f32.xlu1 %v261_v63 }
 0x21d   :  { %392 = vperm.xlu0 %495, %v352_v62  }
 0x28c   :  { %v210_v8 = vpop.xlane.xlu1 %209 }
 0x28d   :  { %v213_v10 = vadd.f32 %v210_v8, %v191_v5 }
 0x28f   :  { %215 = vst.msk [vmem:[#allocation3] sm:$0xff] %vm33_vm3, %v213_v10 }
 0x290   :  { %v212_v13 = vpop.xlane.xlu0 %211  ;;  %v151_v14 = vpop.xlane.xlu1 %150 }
 0x291   :  { %v214_v15 = vadd.f32 %v212_v13, %v192_v12  ;;  %v154_v16 = vadd.f32 %v151_v14, %v146_v11 }
 0x293   :  { %216 = vst.msk [vmem:[#allocation3 + $0x8] sm:$0xff] %vm33_vm3, %v214_v15  ;;  %157 = vst.msk [vmem:[#allocation4] sm:$0xff] %vm33_vm3, %v154_v16 }
 0x294   :  { %v266_v23 = vpop.xlane.xlu0 %265  ;;  %v153_v25 = vpop.xlane.xlu1 %152 }
 0x295   :  { %v268_v28 = vadd.f32 %v266_v23, %v260_v17  ;;  %v155_v29 = vadd.f32 %v153_v25, %v147_v18 }
 0x296   :  { %v276_v32 = vld [vmem:[#allocation3] sm:$0xff] }
 0x297   :  { %270 = vst.msk [vmem:[#allocation6 + $0x8] sm:$0xff] %vm33_vm3, %v268_v28  ;;  %158 = vst.msk [vmem:[#allocation4 + $0x8] sm:$0xff] %vm33_vm3, %v155_v29  ;;  %507 = vlog2.f32 %v276_v32 }
 0x298   :  { %v236_v33 = vpop.xlane.xlu1 %235 }
 0x299   :  { %v239_v34 = vadd.f32 %v236_v33, %v231_v31 }
 0x29a   :  { %v277_v36 = vld [vmem:[#allocation3 + $0x8] sm:$0xff]  ;;  %v288_v45 = vld [vmem:[#allocation4] sm:$0xff] }
 0x29b   :  { %241 = vst.msk [vmem:[#allocation5] sm:$0xff] %vm33_vm3, %v239_v34  ;;  %509 = vlog2.f32 %v277_v36  ;;  %v290_v51 = vmul.f32 0.03125, %v288_v45 }
 0x29c   :  { %v238_v37 = vpop.xlane.xlu1 %237 }
 0x29d   :  { %v240_v38 = vadd.f32 %v238_v37, %v232_v35 }
 0x29e   :  { %v289_v54 = vld [vmem:[#allocation4 + $0x8] sm:$0xff] }
 0x29f   :  { %242 = vst.msk [vmem:[#allocation5 + $0x8] sm:$0xff] %vm33_vm3, %v240_v38  ;;  %v291_v60 = vmul.f32 0.03125, %v289_v54  ;;  %v326_v2 = vld [vmem:[#allocation6 + $0x8] sm:$0xff] }
 0x2a0   :  { %v168_v40 = vpop.xlane.xlu1 %167  ;;  %vm328_vm2 = vcmp.lt.f32.partialorder %v326_v2, 5.0 }
 0x2a1   :  { %v508_v43 = vpop.eup %507  ;;  %v177_v44 = vsel %vm173_vm4, %v168_v40, %v175_v39  ;;  %v461_v17 = vsel %vm328_vm2, 1.0, %v559_v1 }
 0x2a2   :  { %179 = vst.msk [vmem:[#allocation7] sm:$0xff] %vm33_vm3, %v177_v44  ;;  %v279_v47 = vmul.f32 0.6931472, %v508_v43  ;;  %v284_v59 = vld [vmem:[#allocation5] sm:$0xff]  ;;  %v367_v33 = vsel %vm33_vm3, %v461_v17, 0.0 }
 0x2a4   :  { %v170_v49 = vpop.xlane.xlu1 %169  ;;  %v282_v50 = vadd.f32 %v279_v47, %v274_v48 }
 0x2a5   :  { %v510_v52 = vpop.eup %509  ;;  %v178_v53 = vsel %vm174_vm5, %v170_v49, %v176_v46 }
 0x2a6   :  { %180 = vst.msk [vmem:[#allocation7 + $0x8] sm:$0xff] %vm33_vm3, %v178_v53  ;;  %v281_v21 = vmul.f32 0.6931472, %v510_v52  ;;  %v292_v22 = vsub.f32 %v282_v50, %v290_v51  ;;  %v286_v0 = vsub.f32 %v282_v50, %v284_v59  ;;  %v285_v4 = vld [vmem:[#allocation5 + $0x8] sm:$0xff] }
 0x2a8   :  { %v264_v57 = vpop.xlane.xlu1 %263  ;;  %v283_v58 = vadd.f32 %v281_v21, %v275_v56  ;;  %v294_v61 = vmul.f32 0.0, %v292_v22 }
 0x2a9   :  { %v267_v62 = vadd.f32 %v264_v57, %v259_v55  ;;  %v298_v63 = vld [vmem:[#allocation7] sm:$0xff] }
 0x2aa   :  { %vm319_vm1 = vcmp.eq.f32.partialorder %v298_v63, %v48_v20  ;;  %v480_v24 = vtrunc.f32 %v298_v63  ;;  %v293_v26 = vsub.f32 %v283_v58, %v291_v60  ;;  %v296_v5 = vadd.f32 %v294_v61, %v286_v0 }
 0x2ab   :  { %269 = vst.msk [vmem:[#allocation6] sm:$0xff] %vm33_vm3, %v267_v62  ;;  %v458_v3 = vsel %vm319_vm1, 1.0, %v559_v1  ;;  %v287_v8 = vsub.f32 %v283_v58, %v285_v4 }
 0x2ac   :  { %v481_v7 = vcvt.f32.s32 %v480_v24  ;;  %v295_v9 = vmul.f32 0.0, %v293_v26  ;;  %v353_v11 = vmul.f32 %v458_v3, %v732_v41  ;;  %v333_v20 = vmul.f32 %v732_v41, %v296_v5 }
 0x2ad   :  { %v299_v10 = vld [vmem:[#allocation7 + $0x8] sm:$0xff] }
 0x2ae   :  { %v482_v12 = vtrunc.f32 %v299_v10  ;;  %vm320_vm4 = vcmp.eq.f32.partialorder %v299_v10, %v49_v30  ;;  %302 = vst.msk [vmem:[%s853_s7] sm:$0xff] %vm33_vm3, %v481_v7  ;;  %v297_v19 = vadd.f32 %v295_v9, %v287_v8  ;;  %v355_v27 = vsel %vm33_vm3, %v353_v11, 0.0 }
 0x2af   :  { %v459_v13 = vsel %vm320_vm4, 1.0, %v559_v1  ;;  %v335_v41 = vsel %vm33_vm3, %v333_v20, 0.0 }
 0x2b0   :  { %v483_v14 = vcvt.f32.s32 %v482_v12  ;;  %v354_v15 = vmul.f32 %v459_v13, %v737_v42  ;;  %v334_v16 = vmul.f32 %v737_v42, %v297_v19 }
 0x2b2   :  { %303 = vst.msk [vmem:[%s853_s7 + $0x8] sm:$0xff] %vm33_vm3, %v483_v14  ;;  %v356_v30 = vsel %vm33_vm3, %v354_v15, 0.0  ;;  %v336_v18 = vsel %vm33_vm3, %v334_v16, 0.0  ;;  %v325_v23 = vld [vmem:[#allocation6] sm:$0xff]  ;;  %s564_s7 = smov [#allocation8]  }
 0x2b3   :  { %v357_v25 = vadd.f32 %v356_v30, %v355_v27  ;;  %v337_v28 = vadd.f32 %v336_v18, %v335_v41  ;;  %vm327_vm5 = vcmp.lt.f32.partialorder %v325_v23, 5.0  ;;  %s422_s23 = sshll.u32 %s564_s7, 4  ;;  %s423_s23 = int_to_ptr.vmem [resolvable:$true] %s422_s23 }
 0x2b4   :  { %v460_v42 = vsel %vm327_vm5, 1.0, %v559_v1  ;;  %s511_s24 = scalar_lea.vmem %s423_s23, 128  ;;  %p516_p1 = scmp.lt.s32.totalorder %s423_s23, %s423_s23 }
 0x2b5   :  { %v358_v29 = vrot.slane %v357_v25, 4  ;;  %v338_v31 = vrot.slane %v337_v28, 4  ;;  %v366_v32 = vsel %vm33_vm3, %v460_v42, 0.0  ;;  %p512_p0 = scmp.ne.s32.totalorder %s423_s23, %s511_s24  ;;  %p517_p2 = scmp.lt.s32.totalorder %s511_s24, %s511_s24 }
 0x2b6   :  { %v368_v34 = vadd.f32 %v367_v33, %v366_v32 }
 0x2b7   :  { %v359_v35 = vadd.f32 %v358_v29, %v357_v25  ;;  %v339_v36 = vadd.f32 %v338_v31, %v337_v28  ;;  %p518_p3 = por %p517_p2, %p516_p1 }
 0x2b8   :  { %v369_v37 = vrot.slane %v368_v34, 4 }
 0x2b9   :  { %v360_v38 = vrot.slane %v359_v35, 2  ;;  %v340_v39 = vrot.slane %v339_v36, 2  ;;  %p519_p4 = pnand %p518_p3, %p512_p0 }
 0x2ba   :  { %v370_v40 = vadd.f32 %v369_v37, %v368_v34 }
 0x2bb   :  { %v361_v43 = vadd.f32 %v360_v38, %v359_v35  ;;  %v341_v44 = vadd.f32 %v340_v39, %v339_v36 }
 0x2bc   :  { %v371_v45 = vrot.slane %v370_v40, 2 }
 0x2bd   :  { %v362_v46 = vrot.slane %v361_v43, 1  ;;  %v342_v48 = vrot.slane %v341_v44, 1 }
 0x2be   :  { %v372_v1 = vadd.f32 %v371_v45, %v370_v40 }
 0x2bf   :  { %v363_v47 = vadd.f32 %v362_v46, %v361_v43  ;;  %v343_v49 = vadd.f32 %v342_v48, %v341_v44 }
 0x2c0   :  { %v373_v50 = vrot.slane %v372_v1, 1 }
 0x2c1   :  { %400 = vperm.xlu1 %494, %v363_v47  }
 0x2c2   :  { %v374_v51 = vadd.f32 %v373_v50, %v372_v1 }
 0x2c5   :  { %385 = vperm.xlu1 %494, %v343_v49  }
 0x2c9   :  { %408 = vperm.xlu1 %494, %v374_v51  }
 0x2ca   :  { %522 = shalt.err (!%p519_p4)
}
 0x2cb   :  { %s523_s27 = scalar_lea.hbm %s852_s6, 128 }
 0x2cc   :  { %p524_p5 = scmp.ne.s32.totalorder %s852_s6, %s523_s27  ;;  %p527_p6 = scmp.lt.u32.totalorder %s523_s27, %s852_s6 }
 0x2ce   :  { %p529_p7 = pnand %p527_p6, %p524_p5 }
 0x2d0   :  { %532 = shalt.err (!%p529_p7)
}
 0x2d1   :  { %s565_s10 = smov 64   ;;  %s566_s4 = smov 4   ;;  %v567_v52 = vmov 2.0   ;;  %vm389_vm3 = vcmp.eq.s32.totalorder %v626_v6, 1  ;;  %v393_v57 = vpop.permute.xlu0 %392  ;;  %vm382_vm6 = vcmp.eq.s32.totalorder %v626_v6, 0  ;;  %vm397_vm7 = vcmp.eq.s32.totalorder %v626_v6, 2 }
 0x2d2   :  { %428 = dma.vmem_to_hbm [thread:$0]  %s423_s23, 128, %s852_s6, [#allocation9], %s565_s10, %s565_s10, %s566_s4   ;;  %v376_v53 = vrot.slane %v567_v52, 4  ;;  %v395_v59 = vsel %vm389_vm3, %v393_v57, 0.0  ;;  %vm405_vm8 = vcmp.eq.s32.totalorder %v626_v6, 3  ;;  %vm413_vm9 = vcmp.eq.s32.totalorder %v626_v6, 4 }
 0x2d3   :  { %s568_s6 = smov [#allocation10]  }
 0x2d4   :  { %v377_v54 = vadd.f32 2.0, %v376_v53  ;;  %s437_s5 = sshll.u32 %s568_s6, 4  ;;  %s438_s5 = int_to_ptr.vmem [resolvable:$true] %s437_s5 }
 0x2d5   :  { %s533_s12 = scalar_lea.vmem %s438_s5, 16  ;;  %s537_s13 = scalar_lea.vmem %s438_s5, 32 }
 0x2d6   :  { %v378_v55 = vrot.slane %v377_v54, 2  ;;  %p534_p8 = scmp.ne.s32.totalorder %s438_s5, %s533_s12  ;;  %p538_p9 = scmp.lt.s32.totalorder %s438_s5, %s438_s5 }
 0x2d7   :  { %p539_p10 = scmp.lt.s32.totalorder %s537_s13, %s533_s12 }
 0x2d8   :  { %v379_v21 = vadd.f32 %v378_v55, %v377_v54 }
 0x2d9   :  { %p540_p11 = por %p539_p10, %p538_p9 }
 0x2da   :  { %v380_v56 = vrot.slane %v379_v21, 1 }
 0x2db   :  { %p541_p12 = pnand %p540_p11, %p534_p8 }
 0x2dc   :  { %v381_v61 = vadd.f32 %v380_v56, %v379_v21 }
 0x2de   :  { %v414_v2 = vsel %vm413_vm9, %v381_v61, 0.0 }
 0x340   :  { %v401_v22 = vpop.permute.xlu1 %400 }
 0x341   :  { %v403_v63 = vsel %vm397_vm7, %v401_v22, 0.0 }
 0x344   :  { %v386_v58 = vpop.permute.xlu1 %385 }
 0x345   :  { %v388_v60 = vsel %vm382_vm6, %v386_v58, 0.0 }
 0x346   :  { %v396_v62 = vadd.f32 %v395_v59, %v388_v60 }
 0x348   :  { %v404_v0 = vadd.f32 %v403_v63, %v396_v62  ;;  %v409_v24 = vpop.permute.xlu1 %408 }
 0x349   :  { %v411_v26 = vsel %vm405_vm8, %v409_v24, 0.0 }
 0x34a   :  { %v412_v3 = vadd.f32 %v411_v26, %v404_v0 }
 0x34c   :  { %v415_v4 = vadd.f32 %v414_v2, %v412_v3 }
 0x34e   :  { %416 = vst [vmem:[#allocation10] sm:$0x1] %v415_v4 }
 0x34f   :  { %544 = shalt.err (!%p541_p12)
}
 0x350   :  { %s545_s15 = scalar_lea.hbm %s854_s8, 16 }
 0x351   :  { %p546_p13 = scmp.ne.s32.totalorder %s854_s8, %s545_s15  ;;  %p549_p0 = scmp.lt.u32.totalorder %s545_s15, %s854_s8 }
 0x353   :  { %p551_p1 = pnand %p549_p0, %p546_p13 }
 0x355   :  { %554 = shalt.err (!%p551_p1)
}
 0x356   :  { %440 = dma.vmem_to_hbm [thread:$0]  %s438_s5, 16, %s854_s8, [#allocation11]  }
 0x357   :  { %555 = dma.done.wait [#allocation9], 128  }
 0x358   :  { %556 = vsyncadd [#allocation9], 4294967168 }
 0x359   :  { %557 = dma.done.wait [#allocation11], 16  }
 0x35a   :  { %558 = vsyncadd [#allocation11], 4294967280 }
 0x35b   :  { %449 = vsyncpa [#allocation9], 1 }
 0x35c   :  { %450 = vsyncpa [#allocation11], 1 }

</bundles_post_ra>
